<compile_context>
chip_gen: v7x
topology: tpu7x:2x2x1
jax: 0.10.0
libtpu: 0.0.40
codegen_flags: <defaults>
</compile_context>

<pallas_src>
import jax
import jax.numpy as jnp
from jax.experimental import pallas as pl
from jax.experimental.pallas import tpu as pltpu

LN_EPS = 1e-5


def _round_up(x, m):
    return ((x + m - 1) // m) * m


# --------------------------------------------------------------------------- #
# Kernels
# --------------------------------------------------------------------------- #
def _ln_linear_resident_kernel(x_ref, w_ref, b_ref, o_ref):
    """LayerNorm (affine folded into W/b) + Linear with the whole W in VMEM.

    Grid = (row_tiles,). The weight/bias BlockSpec indices are constant, so the
    fused bf16 weight is fetched from HBM once and stays resident; per-step
    traffic is just the x row tile read and the output tile write.
    """
    x = x_ref[...].astype(jnp.float32)                               # (tm, H)
    mean = jnp.mean(x, axis=-1, keepdims=True)
    centered = x - mean
    var = jnp.mean(centered * centered, axis=-1, keepdims=True)      # biased, like torch LN
    normed = (centered * jax.lax.rsqrt(var + LN_EPS)).astype(jnp.bfloat16)
    out = jnp.dot(normed, w_ref[...], preferred_element_type=jnp.float32)
    o_ref[...] = (out + b_ref[...].astype(jnp.float32)).astype(o_ref.dtype)


def _ln_linear_tiled_kernel(x_ref, w_ref, b_ref, o_ref, normed_ref):
    """Fallback when W does not fit in VMEM. Grid = (row_tiles, n_tiles).

    Normalized LHS computed once per row tile (j == 0), cached as bf16 in VMEM
    scratch and reused for every N tile. Only valid while j is the innermost,
    sequential ("arbitrary") grid axis.
    """
    @pl.when(pl.program_id(1) == 0)
    def _():
        x = x_ref[...].astype(jnp.float32)
        mean = jnp.mean(x, axis=-1, keepdims=True)
        centered = x - mean
        var = jnp.mean(centered * centered, axis=-1, keepdims=True)
        normed_ref[...] = (centered * jax.lax.rsqrt(var + LN_EPS)).astype(normed_ref.dtype)

    out = jnp.dot(normed_ref[...], w_ref[...], preferred_element_type=jnp.float32)
    o_ref[...] = (out + b_ref[...].astype(jnp.float32)).astype(o_ref.dtype)


# --------------------------------------------------------------------------- #
# Planning (generation-aware VMEM budget + tile selection)
# --------------------------------------------------------------------------- #
def _vmem_budget():
    try:
        cap = int(pltpu.get_tpu_info().vmem_capacity_bytes)
    except Exception:
        cap = 64 * 2**20                        # conservative fallback (v7x per-TC)
    budget = max(16 * 2**20, int(cap * 0.70))   # ~44 MiB on v7x, ~90 MiB on v5e/v6e
    limit = int(min(cap - 8 * 2**20, budget + 16 * 2**20))
    return budget, limit


def _row_tile_candidates(R):
    if R <= 512:                                # decode / tiny shapes: one 8-aligned tile
        return [_round_up(R, 8)]
    # Large R: prefer big tiles (weight reuse / amortized per-step overhead) but
    # guarantee >= 2 row tiles so megacore (v7x) can shard the "parallel" axis.
    cands = [t for t in (1024, 512, 256, 128) if 2 * t <= R]
    return cands or [_round_up((R + 1) // 2, 8)]


def _choose_plan(R, H, H_out_p, x_isize, o_isize, budget):
    w_bytes = H * H_out_p * 2 + 2 * H_out_p * 4          # resident bf16 W + dbl-buf f32 bias
    # Path A: fully VMEM-resident weight, grid over rows only.
    for tm in _row_tile_candidates(R):
        per_tile = 2 * tm * H * x_isize + 2 * tm * H_out_p * o_isize
        if w_bytes + per_tile <= budget:
            return "resident", tm, H_out_p
    # Path B: tile the output dimension, cache the normalized LHS across j.
    for tm in _row_tile_candidates(R):
        for tn in (2048, 1024, 512, 256, 128):
            if tn > H_out_p or H_out_p % tn:
                continue
            need = (2 * tm * H * x_isize + 2 * H * tn * 2 + 2 * tn * 4
                    + 2 * tm * tn * o_isize + tm * H * 2)
            if need <= budget:
                return "tiled", tm, tn
    # Last resort for pathologically large H: smallest legal tiles.
    return ("tiled",
            128 if R > 128 else _round_up(R, 8),
            128 if H_out_p % 128 == 0 else H_out_p)


# --------------------------------------------------------------------------- #
# Pallas wrapper
# --------------------------------------------------------------------------- #
def layernorm_linear(x2d, w_fused, b_fused, n_out):
    """y = LayerNorm(x2d) @ w_fused + b_fused  (LN affine already folded in).

    x2d:     (R, H)
    w_fused: (H, H_out_p)  bf16, H_out_p padded to a multiple of 128
    b_fused: (1, H_out_p)  f32
    n_out:   true output width (<= H_out_p)
    """
    R, H = x2d.shape
    H_out_p = w_fused.shape[1]
    budget, vmem_limit = _vmem_budget()
    itemsize = jnp.dtype(x2d.dtype).itemsize
    mode, tm, tn = _choose_plan(R, H, H_out_p, itemsize, itemsize, budget)

    if mode == "resident":
        out = pl.pallas_call(
            _ln_linear_resident_kernel,
            out_shape=jax.ShapeDtypeStruct((R, H_out_p), x2d.dtype),
            grid_spec=pltpu.PrefetchScalarGridSpec(
                num_scalar_prefetch=0,
                grid=(pl.cdiv(R, tm),),                 # ragged last tile masked by Pallas
                in_specs=[
                    pl.BlockSpec((tm, H), lambda i: (i, 0)),       # x row tile
                    pl.BlockSpec((H, H_out_p), lambda i: (0, 0)),  # W: constant index -> resident
                    pl.BlockSpec((1, H_out_p), lambda i: (0, 0)),  # fused bias
                ],
                out_specs=pl.BlockSpec((tm, H_out_p), lambda i: (i, 0)),
            ),
            compiler_params=pltpu.CompilerParams(
                dimension_semantics=("parallel",),
                vmem_limit_bytes=vmem_limit,
            ),
        )(x2d, w_fused, b_fused)
    else:
        # TODO(synk): optionally sweep pipeline_mode=pl.Buffered(3) on the weight
        # slab if profiling shows exposed DMA per j step.
        out = pl.pallas_call(
            _ln_linear_tiled_kernel,
            out_shape=jax.ShapeDtypeStruct((R, H_out_p), x2d.dtype),
            grid_spec=pltpu.PrefetchScalarGridSpec(
                num_scalar_prefetch=0,
                grid=(pl.cdiv(R, tm), H_out_p // tn),
                in_specs=[
                    pl.BlockSpec((tm, H), lambda i, j: (i, 0)),    # x row tile (reused over j)
                    pl.BlockSpec((H, tn), lambda i, j: (0, j)),    # bf16 weight column slab
                    pl.BlockSpec((1, tn), lambda i, j: (0, j)),    # fused bias tile
                ],
                out_specs=pl.BlockSpec((tm, tn), lambda i, j: (i, j)),
                scratch_shapes=[pltpu.VMEM((tm, H), jnp.bfloat16)],
            ),
            compiler_params=pltpu.CompilerParams(
                dimension_semantics=("parallel", "arbitrary"),
                vmem_limit_bytes=vmem_limit,
            ),
        )(x2d, w_fused, b_fused)

    if n_out != H_out_p:
        out = out[:, :n_out]   # only when the width was padded to 128 lanes
    return out


# --------------------------------------------------------------------------- #
# Parameter prep (done once) and forward pass
# --------------------------------------------------------------------------- #
def prepare_params(params):
    """Transpose the torch weight, fold the LN affine, pad to lane-dense width.

    y = ((x_hat * gamma + beta) @ W^T + b)
      = x_hat @ (gamma[:, None] * W^T) + (beta @ W^T + b)
    """
    gamma = params["ln_gamma"].astype(jnp.float32)
    beta = params["ln_beta"].astype(jnp.float32)
    w_t = params["linear_w"].astype(jnp.float32).T              # (in, out)
    b = params["linear_b"].astype(jnp.float32)

    w_fused = gamma[:, None] * w_t
    b_fused = beta @ w_t + b
    n_out = w_fused.shape[1]
    n_out_p = _round_up(n_out, 128)                             # lane-dense output stores
    if n_out_p != n_out:
        w_fused = jnp.pad(w_fused, ((0, 0), (0, n_out_p - n_out)))
        b_fused = jnp.pad(b_fused, (0, n_out_p - n_out))
    return {
        "w_fused": w_fused.astype(jnp.bfloat16),                # bf16 for MXU peak
        "b_fused": b_fused.reshape(1, -1),                      # bias stays f32
        "n_out": n_out,
    }


def minimal_model_forward(prepared, input_ids, past_key_values=None):
    """JAX/Pallas equivalent of MinimalModel.forward.

    input_ids: (B, S, H) f32 (the PyTorch module treats them as embeddings)
    past_key_values: optional (B, P, H) f32
    Returns (mixed, new_past_key_values), both (B, S+P, H).
    """
    if past_key_values is not None:
        input_ids = jnp.concatenate([past_key_values, input_ids], axis=1)
    B, T, H = input_ids.shape
    x2d = input_ids.reshape(B * T, H)
    mixed2d = layernorm_linear(x2d, prepared["w_fused"], prepared["b_fused"],
                               prepared["n_out"])
    mixed = mixed2d.reshape(B, T, -1)
    new_past_key_values = input_ids
    return mixed, new_past_key_values


def _reference_forward(params, input_ids, past_key_values=None):
    if past_key_values is not None:
        input_ids = jnp.concatenate([past_key_values, input_ids], axis=1)
    mean = jnp.mean(input_ids, axis=-1, keepdims=True)
    var = jnp.mean((input_ids - mean) ** 2, axis=-1, keepdims=True)
    normed = (input_ids - mean) / jnp.sqrt(var + LN_EPS)
    normed = normed * params["ln_gamma"] + params["ln_beta"]
    mixed = normed @ params["linear_w"].T + params["linear_b"]
    return mixed, input_ids


if __name__ == "__main__":
    B, S, P, H = 2, 8, 4, 32   # batch, new seq, past len, hidden_size

    key = jax.random.PRNGKey(0)
    k1, k2, k3, k4, k5, k6 = jax.random.split(key, 6)

    params = {
        # LayerNorm params (non-trivial to exercise the fused affine path)
        "ln_gamma": 1.0 + 0.1 * jax.random.normal(k1, (H,), jnp.float32),
        "ln_beta": 0.1 * jax.random.normal(k2, (H,), jnp.float32),
        # Linear params, torch convention: weight (out, in), bias (out,)
        "linear_w": jax.random.normal(k3, (H, H), jnp.float32) / jnp.sqrt(H),
        "linear_b": 0.1 * jax.random.normal(k4, (H,), jnp.float32),
    }
    prepared = prepare_params(params)   # done once, outside the forward pass

    input_ids = jax.random.normal(k5, (B, S, H), jnp.float32)
    past_key_values = jax.random.normal(k6, (B, P, H), jnp.float32)

    mixed, new_past = minimal_model_forward(prepared, input_ids, past_key_values)
    jax.block_until_ready((mixed, new_past))

    ref_mixed, ref_past = _reference_forward(params, input_ids, past_key_values)
    assert mixed.shape == (B, S + P, H)
    assert new_past.shape == (B, S + P, H)
    # Tolerance relaxed vs. pure f32 because LHS/weight feed the MXU in bf16
    # (f32 accumulation); LN stats and bias remain f32.
    assert jnp.allclose(mixed, ref_mixed, atol=2e-2, rtol=2e-2)
    assert jnp.allclose(new_past, ref_past)

    print("KERNEL_OK")
</pallas_src>

<mosaic_0001>
module attributes {stable_mosaic.version = 11 : i64} {
  func.func @_ln_linear_resident_kernel(%arg0: i32, %arg1: memref<24x32xf32, #tpu.memory_space<vmem>>, %arg2: memref<32x128xbf16, #tpu.memory_space<vmem>>, %arg3: memref<1x128xf32, #tpu.memory_space<vmem>>, %arg4: memref<24x128xf32, #tpu.memory_space<vmem>>) attributes {dimension_semantics = [#tpu.dimension_semantics<parallel>], iteration_bounds = array<i64: 1>, scalar_prefetch = 0 : i64, scratch_operands = 0 : i64, tpu.core_type = #tpu.core_type<tc>, window_params = [{transform_indices = @transform_0, window_bounds = array<i64: 24, 32>}, {pipeline_mode = #tpu.pipeline_mode<synchronous>, transform_indices = @transform_1, window_bounds = array<i64: 32, 128>}, {pipeline_mode = #tpu.pipeline_mode<synchronous>, transform_indices = @transform_2, window_bounds = array<i64: 1, 128>}, {transform_indices = @transform_3, window_bounds = array<i64: 24, 128>}]} {
    %c0 = arith.constant 0 : index
    %c0_0 = arith.constant 0 : index
    %0 = vector.load %arg1[%c0, %c0_0] : memref<24x32xf32, #tpu.memory_space<vmem>>, vector<24x32xf32>
    %cst = arith.constant dense<0.000000e+00> : vector<24xf32>
    %1 = vector.multi_reduction <add>, %0, %cst [1] : vector<24x32xf32> to vector<24xf32>
    %2 = vector.shape_cast %1 : vector<24xf32> to vector<24x1xf32>
    %cst_1 = arith.constant 3.200000e+01 : f32
    %3 = vector.broadcast %cst_1 : f32 to vector<24x1xf32>
    %4 = arith.divf %2, %3 : vector<24x1xf32>
    %5 = vector.broadcast %4 : vector<24x1xf32> to vector<24x32xf32>
    %6 = arith.subf %0, %5 : vector<24x32xf32>
    %7 = arith.mulf %6, %6 : vector<24x32xf32>
    %cst_2 = arith.constant dense<0.000000e+00> : vector<24xf32>
    %8 = vector.multi_reduction <add>, %7, %cst_2 [1] : vector<24x32xf32> to vector<24xf32>
    %9 = vector.shape_cast %8 : vector<24xf32> to vector<24x1xf32>
    %cst_3 = arith.constant 3.200000e+01 : f32
    %10 = vector.broadcast %cst_3 : f32 to vector<24x1xf32>
    %11 = arith.divf %9, %10 : vector<24x1xf32>
    %cst_4 = arith.constant 9.99999974E-6 : f32
    %12 = vector.broadcast %cst_4 : f32 to vector<24x1xf32>
    %13 = arith.addf %11, %12 : vector<24x1xf32>
    %14 = math.rsqrt %13 : vector<24x1xf32>
    %15 = vector.broadcast %14 : vector<24x1xf32> to vector<24x32xf32>
    %16 = arith.mulf %6, %15 : vector<24x32xf32>
    %17 = arith.truncf %16 : vector<24x32xf32> to vector<24x32xbf16>
    %c0_5 = arith.constant 0 : index
    %c0_6 = arith.constant 0 : index
    %18 = vector.load %arg2[%c0_5, %c0_6] : memref<32x128xbf16, #tpu.memory_space<vmem>>, vector<32x128xbf16>
    %cst_7 = arith.constant dense<0.000000e+00> : vector<24x128xf32>
    %19 = tpu.matmul %17, %18, %cst_7 {dimension_numbers = #tpu.dot_dimension_numbers<[1], [0], [0], [1], [0, 0, 1, 1], [], []>} : vector<24x32xbf16>, vector<32x128xbf16>, vector<24x128xf32> -> vector<24x128xf32>
    %c0_8 = arith.constant 0 : index
    %c0_9 = arith.constant 0 : index
    %20 = vector.load %arg3[%c0_8, %c0_9] : memref<1x128xf32, #tpu.memory_space<vmem>>, vector<1x128xf32>
    %21 = vector.broadcast %20 : vector<1x128xf32> to vector<24x128xf32>
    %22 = arith.addf %19, %21 : vector<24x128xf32>
    %c0_10 = arith.constant 0 : index
    %c0_11 = arith.constant 0 : index
    %23 = vector.load %arg4[%c0_10, %c0_11] : memref<24x128xf32, #tpu.memory_space<vmem>>, vector<24x128xf32>
    tpu.vector_store %arg4[%c0_10, %c0_11], %22 {strides = array<i32>} : memref<24x128xf32, #tpu.memory_space<vmem>>, vector<24x128xf32>,
    return
  }
  func.func @transform_0(%arg0: i32) -> (i32, i32) {
    %c0_i32 = arith.constant 0 : i32
    %c0_i32_0 = arith.constant 0 : i32
    return %arg0, %c0_i32 : i32, i32
  }
  func.func @transform_1(%arg0: i32) -> (i32, i32) {
    %c0_i32 = arith.constant 0 : i32
    %c0_i32_0 = arith.constant 0 : i32
    %c0_i32_1 = arith.constant 0 : i32
    return %c0_i32, %c0_i32_0 : i32, i32
  }
  func.func @transform_2(%arg0: i32) -> (i32, i32) {
    %c0_i32 = arith.constant 0 : i32
    %c0_i32_0 = arith.constant 0 : i32
    %c0_i32_1 = arith.constant 0 : i32
    return %c0_i32, %c0_i32_0 : i32, i32
  }
  func.func @transform_3(%arg0: i32) -> (i32, i32) {
    %c0_i32 = arith.constant 0 : i32
    %c0_i32_0 = arith.constant 0 : i32
    return %arg0, %c0_i32 : i32, i32
  }
}

</mosaic_0001>

<bundles_post_ra>
// kernel: tpu_custom_call.1
= control target key start
LH: loop header
LB: loop body
LE: loop exit
PB: predicated region body
PF: predicated region fallthrough
CT: control target
= control target key end

     0   :  { %8 = vsyncpa [#allocation3], 0  ;;  %s372_s0 = inlined_call_operand.hbm [shape: f32[24,32], index: 0, kind: input, shape index: {}]   ;;  %s373_s1 = inlined_call_operand.hbm [shape: bf16[32,128], index: 1, kind: input, shape index: {}]   ;;  %s374_s2 = inlined_call_operand.vmem [shape: f32[1,128], index: 2, kind: input, shape index: {}]   ;;  %s375_s3 = inlined_call_operand.hbm [shape: f32[24,128], index: 3, kind: output, shape index: {}]  }
   0x1   :  { %9 = vsyncpa [#allocation6], 0 }
   0x2   :  { %10 = vsyncpa [#allocation4], 0  ;;  %s292_s12 = smov [#allocation2]   ;;  %s220_s16 = scalar_lea.hbm %s372_s0, 384 }
   0x3   :  { %s16_s13 = sshll.u32 %s292_s12, 4  ;;  %p221_p0 = scmp.ne.s32.totalorder %s372_s0, %s220_s16  ;;  %s17_s13 = int_to_ptr.vmem [resolvable:$true] %s16_s13 }
   0x4   :  { %p224_p1 = scmp.lt.u32.totalorder %s220_s16, %s372_s0 }
   0x6   :  { %p226_p2 = pnand %p224_p1, %p221_p0 }
   0x8   :  { %229 = shalt.err (!%p226_p2)
}
   0x9   :  { %s230_s21 = scalar_lea.vmem %s17_s13, 384  ;;  %p235_p4 = scmp.lt.s32.totalorder %s17_s13, %s17_s13 }
   0xa   :  { %p231_p3 = scmp.ne.s32.totalorder %s17_s13, %s230_s21  ;;  %p236_p5 = scmp.lt.s32.totalorder %s230_s21, %s230_s21 }
   0xc   :  { %p237_p6 = por %p236_p5, %p235_p4 }
   0xe   :  { %p238_p7 = pnand %p237_p6, %p231_p3 }
  0x10   :  { %241 = shalt.err (!%p238_p7)
}
  0x11   :  { %s293_s22 = smov 128   ;;  %s294_s23 = smov 8  }
  0x12   :  { %22 = dma.hbm_to_vmem [thread:$0]  %s372_s0, 384, %s17_s13, [#allocation3], %s293_s22, %s293_s22, %s294_s23  }
  0x13   :  { %s295_s26 = smov [#allocation5]   ;;  %s242_s30 = scalar_lea.hbm %s373_s1, 256 }
  0x14   :  { %s28_s27 = sshll.u32 %s295_s26, 4  ;;  %p243_p8 = scmp.ne.s32.totalorder %s373_s1, %s242_s30  ;;  %s29_s27 = int_to_ptr.vmem [resolvable:$true] %s28_s27 }
  0x15   :  { %p246_p9 = scmp.lt.u32.totalorder %s242_s30, %s373_s1 }
  0x17   :  { %p248_p10 = pnand %p246_p9, %p243_p8 }
  0x19   :  { %251 = shalt.err (!%p248_p10)
}
  0x1a   :  { %s252_s8 = scalar_lea.vmem %s29_s27, 256  ;;  %p257_p12 = scmp.lt.s32.totalorder %s29_s27, %s29_s27 }
  0x1b   :  { %p253_p11 = scmp.ne.s32.totalorder %s29_s27, %s252_s8  ;;  %p258_p13 = scmp.lt.s32.totalorder %s252_s8, %s252_s8 }
  0x1d   :  { %p259_p0 = por %p258_p13, %p257_p12 }
  0x1f   :  { %p260_p1 = pnand %p259_p0, %p253_p11 }
  0x21   :  { %263 = shalt.err (!%p260_p1)
}
  0x22   :  { %s296_s0 = smov 64   ;;  %s297_s9 = smov 4  }
  0x23   :  { %34 = dma.hbm_to_vmem [thread:$0]  %s373_s1, 256, %s29_s27, [#allocation6], %s296_s0, %s296_s0, %s297_s9  }
  0x24   :  { %286 = dma.done.wait [#allocation3], 384  }
  0x25   :  { %287 = vsyncadd [#allocation3], 4294966912 }
  0x26   :  { %288 = dma.done.wait [#allocation6], 256  }
  0x27   :  { %289 = vsyncadd [#allocation6], 4294967040  ;;  %vm47_vm0 = vcmask 261120   ;;  %v44_v0 = vld [vmem:[#allocation2] sm:$0xff]  ;;  %v46_v1 = vld [vmem:[#allocation2 + $0x10] sm:$0xff]  ;;  %s298_s13 = smov [#allocation7]  }
  0x28   :  { %v45_v2 = vld [vmem:[#allocation2 + $0x8] sm:$0xff]  ;;  %v48_v3 = vsel %vm47_vm0, %v44_v0, 0.0  ;;  %v54_v4 = vsel %vm47_vm0, %v46_v1, 0.0  ;;  %v212_v21 = vld [vmem:[#allocation5] sm:$0xff]   ;;  %v213_v22 = vld [vmem:[#allocation5 + $0x8] sm:$0xff]   ;;  %s175_s14 = sshll.u32 %s298_s13, 4  ;;  %s176_s14 = int_to_ptr.vmem [resolvable:$true] %s175_s14 }
  0x29   :  { %49 = vadd.xlane.f32.xlu0 %v48_v3  ;;  %55 = vadd.xlane.f32.xlu1 %v54_v4  ;;  %v51_v5 = vsel %vm47_vm0, %v45_v2, 0.0  ;;  %v188_v40 = vld [vmem:[%s374_s2] ss:$0 sm:$0xff]  ;;  %s264_s15 = scalar_lea.vmem %s176_s14, 384  ;;  %p269_p3 = scmp.lt.s32.totalorder %s176_s14, %s176_s14 }
  0x2a   :  { %197 = vmatprep.subr.bf16.mxu0 %v212_v21  ;;  %p265_p2 = scmp.ne.s32.totalorder %s176_s14, %s264_s15  ;;  %p270_p4 = scmp.lt.s32.totalorder %s264_s15, %s264_s15 }
  0x2b   :  { %198 = vmatpush3.bf16.msra.mxu0 %v212_v21 }
  0x2c   :  { %199 = vmatprep.subr.bf16.mxu0 %v213_v22  ;;  %p271_p5 = por %p270_p4, %p269_p3 }
  0x2d   :  { %52 = vadd.xlane.f32.xlu0 %v51_v5 }
  0x2e   :  { %p272_p6 = pnand %p271_p5, %p265_p2 }
  0x2f   :  { %200 = vmatpush3.bf16.msra.mxu0 %v213_v22 }
  0xb6   :  { %v50_v6 = vpop.xlane.xlu0 %49  ;;  %v56_v7 = vpop.xlane.xlu1 %55 }
  0xb7   :  { %v58_v8 = vmul.f32 0.03125, %v50_v6  ;;  %v60_v9 = vmul.f32 0.03125, %v56_v7 }
  0xb9   :  { %v61_v10 = vsub.f32 %v44_v0, %v58_v8  ;;  %v63_v11 = vsub.f32 %v46_v1, %v60_v9 }
  0xba   :  { %v53_v12 = vpop.xlane.xlu0 %52 }
  0xbb   :  { %v59_v13 = vmul.f32 0.03125, %v53_v12  ;;  %v64_v14 = vmul.f32 %v61_v10, %v61_v10  ;;  %v66_v15 = vmul.f32 %v63_v11, %v63_v11 }
  0xbd   :  { %v62_v16 = vsub.f32 %v45_v2, %v59_v13  ;;  %v67_v17 = vsel %vm47_vm0, %v64_v14, 0.0  ;;  %v73_v18 = vsel %vm47_vm0, %v66_v15, 0.0 }
  0xbe   :  { %68 = vadd.xlane.f32.xlu1 %v67_v17 }
  0xbf   :  { %v65_v19 = vmul.f32 %v62_v16, %v62_v16 }
  0xc1   :  { %v70_v20 = vsel %vm47_vm0, %v65_v19, 0.0 }
  0xc2   :  { %74 = vadd.xlane.f32.xlu1 %v73_v18  ;;  %71 = vadd.xlane.f32.xlu0 %v70_v20 }
 0x14b   :  { %v69_v23 = vpop.xlane.xlu1 %68 }
 0x14c   :  { %v76_v24 = vmul.f32 0.03125, %v69_v23 }
 0x14e   :  { %v79_v25 = vadd.f32 1e-05, %v76_v24 }
 0x14f   :  { %v75_v26 = vpop.xlane.xlu1 %74  ;;  %v72_v27 = vpop.xlane.xlu0 %71 }
 0x150   :  { %v78_v28 = vmul.f32 0.03125, %v75_v26  ;;  %v77_v29 = vmul.f32 0.03125, %v72_v27  ;;  %214 = vrsqrt.f32 %v79_v25 }
 0x152   :  { %v81_v30 = vadd.f32 1e-05, %v78_v28  ;;  %v80_v31 = vadd.f32 1e-05, %v77_v29 }
 0x154   :  { %216 = vrsqrt.f32 %v81_v30 }
 0x155   :  { %218 = vrsqrt.f32 %v80_v31 }
 0x15a   :  { %v215_v32 = vpop.eup %214 }
 0x15b   :  { %v85_v36 = vmul.f32 %v215_v32, %v61_v10 }
 0x15e   :  { %v217_v33 = vpop.eup %216 }
 0x15f   :  { %v219_v34 = vpop.eup %218  ;;  %v87_v35 = vmul.f32 %v217_v33, %v63_v11 }
 0x160   :  { %v86_v37 = vmul.f32 %v219_v34, %v62_v16 }
 0x161   :  { %v89_v38 = vpack.c.bf16 %v87_v35, %v87_v35 }
 0x162   :  { %v88_v39 = vpack.c.bf16 %v86_v37, %v85_v36 }
 0x164   :  { %201 = vmatprep.mubr.msk.bf16.mxu0 %vm47_vm0, %v88_v39 }
 0x165   :  { %202 = vmatmul.mubr.msk.bf16.vlgmr.msra.gmra.mrb[0].mxu0 %vm47_vm0, %v89_v38 }
 0x238   :  { %v203_v41 = vpop.f32.mrb[0].mxu0 }
 0x239   :  { %v162_v42 = vadd.f32 %v203_v41, %v188_v40  ;;  %v153_v43 = vpop.f32.mrb[1].mxu0 }
 0x23a   :  { %v154_v44 = vadd.f32 %v188_v40, %v153_v43  ;;  %v204_v45 = vpop.f32.mrb[2].mxu0 }
 0x23b   :  { %169 = vst [vmem:[#allocation7 + $0x10] sm:$0xff] %v162_v42  ;;  %v156_v46 = vpop.f32.mrb[3].mxu0 }
 0x23c   :  { %167 = vst [vmem:[#allocation7] sm:$0xff] %v154_v44  ;;  %v157_v47 = vadd.f32 %v188_v40, %v156_v46 }
 0x23e   :  { %168 = vst [vmem:[#allocation7 + $0x8] sm:$0xff] %v157_v47 }
 0x23f   :  { %275 = shalt.err (!%p272_p6)
}
 0x240   :  { %s276_s17 = scalar_lea.hbm %s375_s3, 384 }
 0x241   :  { %p277_p7 = scmp.ne.s32.totalorder %s375_s3, %s276_s17  ;;  %p280_p8 = scmp.lt.u32.totalorder %s276_s17, %s375_s3 }
 0x243   :  { %p282_p9 = pnand %p280_p8, %p277_p7 }
 0x245   :  { %285 = shalt.err (!%p282_p9)
}
 0x246   :  { %181 = dma.vmem_to_hbm [thread:$0]  %s176_s14, 384, %s375_s3, [#allocation4], %s293_s22, %s293_s22, %s294_s23  }
 0x247   :  { %290 = dma.done.wait [#allocation4], 384  }
 0x248   :  { %291 = vsyncadd [#allocation4], 4294966912 }
 0x249   :  { %185 = vsyncpa [#allocation3], 1 }
 0x24a   :  { %186 = vsyncpa [#allocation6], 1 }
 0x24b   :  { %187 = vsyncpa [#allocation4], 1 }

</bundles_post_ra>
